<compile_context>
chip_gen: v6e
topology: v6e:2x2x1
jax: 0.10.0
libtpu: 0.0.40
codegen_flags: <defaults>
</compile_context>

<pallas_src>
import math
from functools import partial

import jax
import jax.numpy as jnp
from jax.experimental import pallas as pl
from jax.experimental.pallas import tpu as pltpu

_LANE = 128
_SUBLANE = 8


def make_positional_encoding(d_model: int, max_len: int = 5000) -> jnp.ndarray:
    """Deterministic buffer, identical math to the PyTorch __init__ (incl. *0.05)."""
    d_model_use = d_model if d_model % 2 == 0 else d_model + 1
    position = jnp.arange(0, max_len, dtype=jnp.float32)[:, None]           # (max_len, 1)
    div_term = jnp.exp(
        jnp.arange(0, d_model_use, 2, dtype=jnp.float32)
        * (-math.log(10000.0) / d_model)
    )                                                                        # (d_model_use//2,)
    pe = jnp.zeros((max_len, d_model_use), dtype=jnp.float32)
    pe = pe.at[:, 0::2].set(jnp.sin(position * div_term))
    pe = pe.at[:, 1::2].set(jnp.cos(position * div_term))
    pe = pe[:, :d_model] * 0.05          # the 0.05 scale IS in the PyTorch module
    return pe.astype(jnp.float32)        # (max_len, d_model)


# ----------------------------- kernels ---------------------------------------


def _pos_enc_rows_kernel(x_ref, pe_ref, o_ref):
    # x/pe/o blocks are (TR, W): straight per-vreg VPU add, no broadcast op.
    o_ref[...] = (x_ref[...] + pe_ref[...]).astype(o_ref.dtype)


def _pos_enc_batched_kernel(x_ref, pe_ref, o_ref):
    # x/o blocks are (TB, R, W); pe block is (R, W) broadcast over the leading
    # (batch) dim -- pure vreg reuse on the VPU, no XLU cost.
    o_ref[...] = (x_ref[...] + pe_ref[...][None, :, :]).astype(o_ref.dtype)


# --------------------------- tiling helpers -----------------------------------


def _gen_params() -> tuple[int, int]:
    """(per-block byte target, vmem_limit_bytes), derived from the chip generation."""
    try:
        info = pltpu.get_tpu_info()
        cap = int(getattr(info, "vmem_capacity_bytes", 64 << 20))
    except Exception:  # pragma: no cover - conservative fallback (v7x-sized)
        cap = 64 << 20
    vmem_limit = max(int(0.55 * cap), 16 << 20)       # ~35 MiB v7x, ~70 MiB v5e/v6e
    target = max(1 << 20, min(4 << 20, vmem_limit // 10))
    return target, vmem_limit


def _choose_cols(S: int, D: int) -> tuple[int, int]:
    """Pick (R, W) with R*W == S*D and W lane-dense (multiple of 128) if possible."""
    total = S * D
    if D % _LANE == 0:
        return S, D
    if total % _LANE == 0:
        cap = 16384                                   # keep a single row <= 64 KiB f32
        w = (min(total, cap) // _LANE) * _LANE
        while w >= _LANE:
            if total % w == 0:
                return total // w, w
            w -= _LANE
    # TODO(synk): W = D < 128 here -> masked vst.msk stores; if this shape is hot,
    # pad D to a multiple of 128 at the data-layout level upstream, not in-wrapper.
    return S, D


def _choose_row_tile(R: int, W: int, itemsize: int, target_bytes: int) -> int:
    """Largest multiple-of-8 divisor of R whose (TR, W) block is <= target_bytes."""
    max_rows = max(1, target_bytes // max(1, W * itemsize))
    if max_rows >= R:
        return R
    r = max(_SUBLANE, (min(R, max_rows) // _SUBLANE) * _SUBLANE)
    for cand in range(r, _SUBLANE - 1, -_SUBLANE):
        if R % cand == 0:
            return cand                               # exact divisor: no ragged tail
    return min(R, r)                                  # fallback: Pallas masks the tail


# ------------------------------ pallas call -----------------------------------


@partial(jax.jit, static_argnames=("target_bytes",))
def _pos_enc_pallas(x3: jnp.ndarray, pe2: jnp.ndarray, *, target_bytes=None):
    """x3: (B, R, W) lane-dense slab; pe2: (R, W) matching slab. Returns x3 + pe2."""
    B, R, W = x3.shape
    itemsize = jnp.dtype(x3.dtype).itemsize
    tgt, vmem_limit = _gen_params()
    if target_bytes is not None:
        tgt = int(target_bytes)

    slab_bytes = R * W * itemsize

    if slab_bytes <= tgt:
        # --- Mode A: small per-batch slab -> fold batch into the block --------
        tb = max(1, min(B, tgt // max(1, slab_bytes)))
        if B >= 2:
            tb = min(tb, -(-B // 2))                  # >=2 tiles so both v7x TCs work
        nb = pl.cdiv(B, tb)
        return pl.pallas_call(
            _pos_enc_batched_kernel,
            out_shape=jax.ShapeDtypeStruct((B, R, W), x3.dtype),
            grid_spec=pltpu.PrefetchScalarGridSpec(
                num_scalar_prefetch=0,
                grid=(nb,),
                in_specs=[
                    pl.BlockSpec((tb, R, W), lambda b: (b, 0, 0)),
                    pl.BlockSpec((R, W), lambda b: (0, 0)),   # pe stays resident
                ],
                out_specs=pl.BlockSpec((tb, R, W), lambda b: (b, 0, 0)),
            ),
            compiler_params=pltpu.CompilerParams(
                dimension_semantics=("parallel",),
                vmem_limit_bytes=vmem_limit,
            ),
        )(x3, pe2)

    # --- Mode B: large per-batch slab -> row-tile, batch innermost ------------
    TR = _choose_row_tile(R, W, itemsize, tgt)
    NR = pl.cdiv(R, TR)                               # >= 2 here (slab > target)
    return pl.pallas_call(
        _pos_enc_rows_kernel,
        out_shape=jax.ShapeDtypeStruct((B, R, W), x3.dtype),
        grid_spec=pltpu.PrefetchScalarGridSpec(
            num_scalar_prefetch=0,
            grid=(NR, B),                             # batch innermost: pe tile resident
            in_specs=[
                pl.BlockSpec((None, TR, W), lambda r, b: (b, r, 0)),
                pl.BlockSpec((TR, W), lambda r, b: (r, 0)),
            ],
            out_specs=pl.BlockSpec((None, TR, W), lambda r, b: (b, r, 0)),
        ),
        compiler_params=pltpu.CompilerParams(
            dimension_semantics=("parallel", "parallel"),
            vmem_limit_bytes=vmem_limit,
        ),
    )(x3, pe2)


# ------------------------------ module wrapper ---------------------------------


class PositionalEncodingPallas:
    """Forward-only Pallas port of the PyTorch PositionalEncoding module.

    TODO(synk): nn.Dropout is declared in the PyTorch __init__ but never applied
    in forward, so it is intentionally omitted here.
    """

    def __init__(self, d_model: int, dropout: float = 0.1, max_len: int = 5000):
        self.d_model = d_model
        self.max_len = max_len
        self.pe = make_positional_encoding(d_model, max_len)   # (max_len, d_model) f32
        self._pe_cache = {}                                    # (S, dtype, R, W) -> (R, W)

    def _prepared_pe(self, S: int, dtype, R: int, W: int) -> jnp.ndarray:
        key = (S, jnp.dtype(dtype).name, R, W)
        buf = self._pe_cache.get(key)
        if buf is None:
            # Hoisted out of the steady-state per-call path (once per seq_len/dtype).
            # TODO(synk): casting pe to x.dtype differs from PyTorch's implicit
            # promotion (bf16 x + f32 pe -> f32 output) when x is not float32.
            buf = self.pe[:S, :].astype(dtype).reshape(R, W)
            buf = jax.block_until_ready(buf)
            self._pe_cache[key] = buf
        return buf

    def __call__(self, x: jnp.ndarray, *, target_bytes=None) -> jnp.ndarray:
        B, S, D = x.shape
        assert D == self.d_model and S <= self.max_len
        R, W = _choose_cols(S, D)                     # lane-dense slab shape
        pe2 = self._prepared_pe(S, x.dtype, R, W)
        x3 = x.reshape(B, R, W)                       # free, contiguous reshape
        out = _pos_enc_pallas(x3, pe2, target_bytes=target_bytes)
        return out.reshape(B, S, D)


# ---------------------------------- main ---------------------------------------


if __name__ == "__main__":
    # Shapes implied by the forward: (batch, seq_len, d_model)
    B, S, D = 2, 8, 32
    key = jax.random.PRNGKey(0)
    x = jax.random.normal(key, (B, S, D), dtype=jnp.float32)

    module = PositionalEncodingPallas(d_model=D, dropout=0.1, max_len=5000)
    out = jax.block_until_ready(module(x))

    ref = x + module.pe[None, :S, :].astype(x.dtype)
    assert out.shape == (B, S, D)
    assert jnp.allclose(out, ref, atol=1e-6, rtol=1e-6), "mismatch vs reference (mode A)"

    # Also exercise the row-tiled (large-slab) path at small shape by forcing a
    # tiny per-block byte target.
    B2, S2, D2 = 2, 64, 128
    x2 = jax.random.normal(jax.random.PRNGKey(1), (B2, S2, D2), dtype=jnp.float32)
    module2 = PositionalEncodingPallas(d_model=D2, max_len=5000)
    out2 = jax.block_until_ready(module2(x2, target_bytes=8 * 1024))
    ref2 = x2 + module2.pe[None, :S2, :].astype(x2.dtype)
    assert jnp.allclose(out2, ref2, atol=1e-6, rtol=1e-6), "mismatch vs reference (mode B)"

    print("KERNEL_OK")
</pallas_src>

<mosaic_0001>
module attributes {stable_mosaic.version = 11 : i64} {
  func.func @_pos_enc_batched_kernel(%arg0: i32, %arg1: memref<1x1x256xf32, #tpu.memory_space<vmem>>, %arg2: memref<1x256xf32, #tpu.memory_space<vmem>>, %arg3: memref<1x1x256xf32, #tpu.memory_space<vmem>>) attributes {dimension_semantics = [#tpu.dimension_semantics<parallel>], iteration_bounds = array<i64: 2>, scalar_prefetch = 0 : i64, scratch_operands = 0 : i64, tpu.core_type = #tpu.core_type<tc>, window_params = [{transform_indices = @transform_0, window_bounds = array<i64: 1, 1, 256>}, {pipeline_mode = #tpu.pipeline_mode<synchronous>, transform_indices = @transform_1, window_bounds = array<i64: 1, 256>}, {transform_indices = @transform_2, window_bounds = array<i64: 1, 1, 256>}]} {
    %c0 = arith.constant 0 : index
    %c0_0 = arith.constant 0 : index
    %c0_1 = arith.constant 0 : index
    %0 = vector.load %arg1[%c0, %c0_0, %c0_1] : memref<1x1x256xf32, #tpu.memory_space<vmem>>, vector<1x1x256xf32>
    %c0_2 = arith.constant 0 : index
    %c0_3 = arith.constant 0 : index
    %1 = vector.load %arg2[%c0_2, %c0_3] : memref<1x256xf32, #tpu.memory_space<vmem>>, vector<1x256xf32>
    %2 = vector.shape_cast %1 : vector<1x256xf32> to vector<1x1x256xf32>
    %3 = arith.addf %0, %2 : vector<1x1x256xf32>
    %c0_4 = arith.constant 0 : index
    %c0_5 = arith.constant 0 : index
    %c0_6 = arith.constant 0 : index
    %4 = vector.load %arg3[%c0_4, %c0_5, %c0_6] : memref<1x1x256xf32, #tpu.memory_space<vmem>>, vector<1x1x256xf32>
    tpu.vector_store %arg3[%c0_4, %c0_5, %c0_6], %3 {strides = array<i32>} : memref<1x1x256xf32, #tpu.memory_space<vmem>>, vector<1x1x256xf32>,
    return
  }
  func.func @transform_0(%arg0: i32) -> (i32, i32, i32) {
    %c0_i32 = arith.constant 0 : i32
    %c0_i32_0 = arith.constant 0 : i32
    %c0_i32_1 = arith.constant 0 : i32
    return %arg0, %c0_i32, %c0_i32_0 : i32, i32, i32
  }
  func.func @transform_1(%arg0: i32) -> (i32, i32) {
    %c0_i32 = arith.constant 0 : i32
    %c0_i32_0 = arith.constant 0 : i32
    %c0_i32_1 = arith.constant 0 : i32
    return %c0_i32, %c0_i32_0 : i32, i32
  }
  func.func @transform_2(%arg0: i32) -> (i32, i32, i32) {
    %c0_i32 = arith.constant 0 : i32
    %c0_i32_0 = arith.constant 0 : i32
    %c0_i32_1 = arith.constant 0 : i32
    return %arg0, %c0_i32, %c0_i32_0 : i32, i32, i32
  }
}

</mosaic_0001>

<bundles_post_ra>
// kernel: _pos_enc_pallas.1
= control target key start
LH: loop header
LB: loop body
LE: loop exit
PB: predicated region body
PF: predicated region fallthrough
CT: control target
= control target key end

     0   :  { %7 = vsyncpa [#allocation3], 0  ;;  %s659_s0 = inlined_call_operand.hbm [shape: f32[2,1,256], index: 0, kind: input, shape index: {}]   ;;  %s660_s1 = inlined_call_operand.hbm [shape: f32[1,256], index: 1, kind: input, shape index: {}]   ;;  %s661_s2 = inlined_call_operand.hbm [shape: f32[2,1,256], index: 2, kind: output, shape index: {}]  }
   0x1   :  { %9 = vsyncpa [#allocation3 + $0x1], 0 }
   0x2   :  { %10 = vsyncpa [#allocation6], 0 }
   0x3   :  { %11 = vsyncpa [#allocation4], 0 }
   0x4   :  { %13 = vsyncpa [#allocation4 + $0x1], 0  ;;  %s493_s9 = smov 0   ;;  %s495_s10 = smov 0  }
   0x5   :  { %s497_s11 = smov 0   ;;  %s499_s12 = smov 0  }
   0x6 LB: > { %s514_s13 = sadd.s32 4294967295, %s473_s12   ;;  %s276_s14 = sadd.s32 4294967294, %s473_s12   ;;  %s473_s12 = sphi %s499_s12, %s684_s12   ;;  %s469_s11 = sphi %s497_s11, %s683_s11   ;;  %s465_s10 = sphi %s495_s10, %s682_s10   ;;  %s461_s9 = sphi %s493_s9, %s681_s9  }
   0x7   : > { %p39_p0 = scmp.ne.s32.totalorder %s465_s10, %s461_s9  ;;  %p662_p1 = scmp.eq.s32.totalorder %s514_s13, 0 }
   0x8   : > { %p90_p3 = scmp.eq.s32.totalorder %s276_s14, 1  ;;  %p277_p5 = scmp.ge.s32.totalorder %s473_s12, 1 }
   0x9   : > { %p523_p4 = por %p662_p1, %p39_p0  ;;  %p97_p7 = scmp.lt.s32.totalorder %s473_s12, 3 }
   0xa   : > { %p528_p6 = por %p90_p3, %p39_p0  ;;  %s475_s18 = smov [#allocation5]  }
   0xb   : > { %s666_s15 = scalar_select %p523_p4, 1, 0 }
   0xc   : > { %s667_s16 = scalar_select %p528_p6, 1, 0 }
   0xd   : > { %p533_p8 = pnand %p277_p5, %p97_p7  ;;  %s110_s19 = sshll.u32 %s475_s18, 4  ;;  %s111_s19 = int_to_ptr.vmem [resolvable:$true] %s110_s19 }
   0xe   : > { %s541_s20 = sadd.s32 1, %s473_s12   ;;  %s26_s24 = sadd.s32 1, %s469_s11 }
   0xf   : > { %s668_s17 = scalar_select %p533_p8, 1, 0 }
  0x10   : > { %p302_p10 = pneg %p533_p8  ;;  %s23_s22 = ssub.s32 %s473_s12, %s541_s20 }
  0x11   : > { %p551_p12 = scmp.eq.s32.totalorder %s23_s22, 0  ;;  %p33_p13 = scmp.ne.s32.totalorder %s469_s11, %s465_s10 }
  0x12   : > { %p545_p11 = pnand %p302_p10, %p662_p1  ;;  %s362_s25 = scalar_lea.vmem %s111_s19, 32 }
  0x13   : > { %p363_p3 = scmp.ne.s32.totalorder %s111_s19, %s362_s25  ;;  %p370_p9 = scmp.lt.s32.totalorder %s111_s19, %s111_s19 }
  0x14   : > { %p353_p0 = pneg %p545_p11  ;;  %p371_p2 = scmp.lt.s32.totalorder %s362_s25, %s362_s25 }
  0x16   : > { %p365_p5 = pnand %p363_p3, %p353_p0  ;;  %p372_p10 = por %p371_p2, %p370_p9 }
  0x18   : > { %p366_p7 = pneg %p365_p5 }
  0x1a   : > { %p373_p1 = pnand %p372_p10, %p366_p7 }
  0x1c   : > { %376 = shalt.err (!%p373_p1)
}
  0x1d   : > { %305 = dma.hbm_to_vmem [thread:$0]  (!%p545_p11), %s660_s1, 32, %s111_s19, [#allocation6]  }
  0x1e   : > { %s568_s28 = scalar_select %p551_p12, %s469_s11, %s26_s24  }
  0x1f   : > { %p34_p1 = scmp.eq.s32.totalorder %s473_s12, 0  ;;  %p671_p2 = scmp.eq.s32.totalorder %s514_s13, 1 }
  0x20   : > { %p315_p0 = scmp.lt.s32.totalorder %s473_s12, 2  ;;  %s121_s30 = sand.u32 1, %s469_s11  }
  0x21   : > { %p576_p9 = por %p671_p2, %p33_p13  ;;  %p35_p3 = por %p34_p1, %p33_p13 }
  0x22   : > { %s280_s3 = sshll.u32 %s121_s30, 1  ;;  %s292_s4 = sshll.u32 %s473_s12, 5 }
  0x23   : > { %s672_s29 = scalar_select %p576_p9, 1, 0 }
  0x24   : > { %s589_s7 = scalar_lea.hbm %s659_s0, %s292_s4  ;;  %s125_s8 = scalar_lea.vmem [#allocation2], %s280_s3 }
  0x25   : > { %s133_s14 = sshll.u32 %s125_s8, 4  ;;  %p591_p11 = pnand %p315_p0, %p35_p3  ;;  %s134_s14 = int_to_ptr.vmem [resolvable:$true] %s133_s14 }
  0x26   : > { %s122_s19 = scalar_lea.sflag [#allocation3], %s121_s30  ;;  %s377_s21 = scalar_lea.hbm %s589_s7, 32 }
  0x27   : > { %p378_p12 = scmp.ne.s32.totalorder %s589_s7, %s377_s21  ;;  %p379_p13 = pneg %p591_p11 }
  0x28   : > { %s382_s24 = scalar_lea.hbm %s659_s0, 64  ;;  %p383_p10 = scmp.lt.s32.totalorder %s589_s7, %s659_s0 }
  0x29   : > { %p380_p5 = pnand %p379_p13, %p378_p12  ;;  %p384_p1 = scmp.lt.s32.totalorder %s382_s24, %s377_s21 }
  0x2b   : > { %p381_p7 = pneg %p380_p5  ;;  %p385_p2 = por %p384_p1, %p383_p10 }
  0x2d   : > { %p386_p0 = pnand %p385_p2, %p381_p7 }
  0x2f   : > { %389 = shalt.err (!%p386_p0)
}
  0x30   : > { %s390_s27 = scalar_lea.vmem %s134_s14, 32  ;;  %s476_s30 = smov [#allocation2]  }
  0x31   : > { %p391_p3 = scmp.ne.s32.totalorder %s134_s14, %s390_s27  ;;  %s395_s3 = sshll.u32 %s476_s30, 4  ;;  %s396_s3 = int_to_ptr.vmem [resolvable:$false] %s395_s3 }
  0x32   : > { %s397_s4 = scalar_lea.vmem %s396_s3, 64  ;;  %p398_p12 = scmp.lt.s32.totalorder %s134_s14, %s396_s3 }
  0x33   : > { %p393_p6 = pnand %p391_p3, %p379_p13  ;;  %p399_p5 = scmp.lt.s32.totalorder %s397_s4, %s390_s27 }
  0x35   : > { %p394_p9 = pneg %p393_p6  ;;  %p400_p4 = por %p399_p5, %p398_p12 }
  0x37   : > { %p401_p8 = pnand %p400_p4, %p394_p9 }
  0x39   : > { %404 = shalt.err (!%p401_p8)
}
  0x3a   : > { %309 = dma.hbm_to_vmem [thread:$0]  (!%p591_p11), %s589_s7, 32, %s134_s14, %s122_s19  }
  0x3b   : > { %p674_p7 = scmp.ne.s32.totalorder %s668_s17, 0 }
  0x3c   : > { %s612_s5 = sand.u32 (!%p674_p7), 1, %s465_s10   ;;  %p675_p6 = scmp.ne.s32.totalorder (!%p674_p7), %s666_s15, 0 }
  0x3d   : > { %142 = sbr.rel (%p674_p7) target bundleno = 95 (0x5f), region = 28  ;;  %s284_s6 = sshll.u32 (!%p674_p7), %s612_s5, 1 }
  0x3e   : > { %s145_s8 = scalar_lea.sflag (!%p674_p7), [#allocation3], %s612_s5  ;;  %s148_s21 = scalar_lea.vmem (!%p674_p7), [#allocation2], %s284_s6 }
  0x42   : > { %448 = dma.done.wait (%p675_p6), %s145_s8, 32  }
  0x43   : > { %450 = vsyncadd (%p675_p6), %s145_s8, 4294967264  ;;  %p676_p4 = scmp.eq.s32.totalorder %s514_s13, 0 }
  0x45   : > { %452 = dma.done.wait (%p676_p4), [#allocation6], 32   ;;  %p677_p8 = pmov %p676_p4 }
  0x46   : > { %v176_v0 = vlaneseq  ;;  %s172_s17 = scalar_lea.vmem [#allocation7], %s284_s6  ;;  %s293_s14 = sshll.u32 %s514_s13, 5  ;;  %v173_v1 = vld [vmem:[%s148_s21] sm:$0x3]  ;;  %v174_v2 = vld [vmem:[#allocation5] sm:$0x3] }
  0x47   : > { %454 = vsyncadd (%p677_p8), [#allocation6], 4294967264  ;;  %s196_s7 = sshll.u32 %s172_s17, 4  ;;  %v175_v3 = vadd.f32 %v174_v2, %v173_v1  ;;  %s194_s19 = scalar_lea.hbm %s661_s2, %s293_s14  ;;  %s197_s7 = int_to_ptr.vmem [resolvable:$true] %s196_s7 }
  0x48   : > { %vm178_vm0 = vcmp.lt.s32.totalorder %v176_v0, 256  ;;  %s182_s22 = scalar_lea.sflag [#allocation4], %s612_s5  ;;  %s405_s23 = scalar_lea.vmem %s197_s7, 32 }
  0x49   : > { %180 = vst.msk [vmem:[%s172_s17] sm:$0x3] %vm178_vm0, %v175_v3  ;;  %p406_p9 = scmp.ne.s32.totalorder %s197_s7, %s405_s23  ;;  %p678_p11 = scmp.ne.s32.totalorder %s672_s29, 0 }
  0x4a   : > { %s477_s24 = smov [#allocation7]  }
  0x4b   : > { %p407_p13 = pnand %p406_p9, %p678_p11  ;;  %s409_s25 = sshll.u32 %s477_s24, 4  ;;  %s410_s25 = int_to_ptr.vmem [resolvable:$false] %s409_s25 }
  0x4c   : > { %s411_s13 = scalar_lea.vmem %s410_s25, 64  ;;  %p412_p1 = scmp.lt.s32.totalorder %s197_s7, %s410_s25 }
  0x4d   : > { %p408_p10 = pneg %p407_p13  ;;  %p413_p2 = scmp.lt.s32.totalorder %s411_s13, %s405_s23 }
  0x4f   : > { %p414_p0 = por %p413_p2, %p412_p1 }
  0x51   : > { %p415_p3 = pnand %p414_p0, %p408_p10 }
  0x53   : > { %418 = shalt.err (!%p415_p3)
}
  0x54   : > { %s419_s26 = scalar_lea.hbm %s194_s19, 32  ;;  %s423_s3 = scalar_lea.hbm %s661_s2, 64 }
  0x55   : > { %p420_p12 = scmp.ne.s32.totalorder %s194_s19, %s419_s26  ;;  %p424_p6 = scmp.lt.s32.totalorder %s194_s19, %s661_s2 }
  0x56   : > { %p425_p4 = scmp.lt.s32.totalorder %s423_s3, %s419_s26 }
  0x57   : > { %p421_p5 = pnand %p420_p12, %p678_p11 }
  0x58   : > { %p426_p8 = por %p425_p4, %p424_p6 }
  0x59   : > { %p422_p7 = pneg %p421_p5 }
  0x5b   : > { %p427_p9 = pnand %p426_p8, %p422_p7 }
  0x5d   : > { %430 = shalt.err (!%p427_p9)
}
  0x5e   : > { %300 = dma.vmem_to_hbm [thread:$0]  (%p678_p11), %s197_s7, 32, %s194_s19, %s182_s22  }
  0x5f PF: > { %s208_s6 = sand.u32 1, %s461_s9   ;;  %p679_p13 = scmp.ne.s32.totalorder %s667_s16, 0 }
  0x60   : > { %p680_p10 = scmp.ge.s32.totalorder %s473_s12, 2  ;;  %s209_s8 = scalar_lea.sflag [#allocation4], %s208_s6 }
  0x62   : > { %p311_p1 = pnand %p680_p10, %p679_p13 }
  0x64   : > { %p312_p2 = pneg %p311_p1 }
  0x66   : > { %456 = dma.done.wait (%p312_p2), %s209_s8, 32  }
  0x67   : > { %458 = vsyncadd (%p312_p2), %s209_s8, 4294967264  ;;  %p16_p0 = scmp.ge.s32.totalorder %s541_s20, 4   ;;  %s681_s9 = smov %s465_s10 }
  0x68   : > { %s682_s10 = smov %s469_s11  ;;  %s683_s11 = smov %s568_s28 }
  0x69   : > { %s684_s12 = smov %s541_s20  ;;  %18 = sbr.rel (!%p16_p0) target bundleno = 6 (0x6), region = 77 }
  0x6e   :  { %214 = vsyncpa [#allocation3], 1 }
  0x6f   :  { %216 = vsyncpa [#allocation3 + $0x1], 1 }
  0x70   :  { %217 = vsyncpa [#allocation6], 1 }
  0x71   :  { %218 = vsyncpa [#allocation4], 1 }
  0x72   :  { %220 = vsyncpa [#allocation4 + $0x1], 1 }

</bundles_post_ra>
